<compile_context>
chip_gen: v6e
topology: v6e:2x2x1
jax: 0.10.0
libtpu: 0.0.40
codegen_flags: <defaults>
</compile_context>

<pallas_src>
import jax
import jax.numpy as jnp
import numpy as np
from jax import lax
from jax.experimental import pallas as pl
from jax.experimental.pallas import tpu as pltpu
from jax.scipy.special import gammaln, logsumexp


# ----------------------------- Pallas kernel ------------------------------ #

def watson_logpdf_kernel(params_ref, mu_ref, x_ref, o_ref):
    """params_ref: SMEM (2,) = [kappa_pos, logC]
       mu_ref:     VMEM (1, p)  unit-norm mu, already in X.dtype
       x_ref:      VMEM (TN, p) tile of X (rows on sublanes, p on lanes)
       o_ref:      VMEM (1, TN) lane-dense logpdf row for this tile
    """
    kappa_pos = params_ref[0]
    log_c = params_ref[1]

    mu_unit = mu_ref[...]                         # (1, p), same dtype as X
    x = x_ref[...]                                # (TN, p); fed to MXU natively

    # (1, TN) = mu (1, p) @ X^T : contract over p on the MXU with f32
    # accumulation.  Result is produced directly in lane-dense orientation
    # for an unmasked store.
    dots = lax.dot_general(
        mu_unit, x,
        dimension_numbers=(((1,), (1,)), ((), ())),
        preferred_element_type=jnp.float32)

    o_ref[...] = log_c + kappa_pos * dots * dots


# --------------------------- tile-size selection --------------------------- #

def _round_up(x, m):
    return ((x + m - 1) // m) * m


def _choose_tile_rows(N, p, itemsize, budget_bytes=16 * 1024 * 1024):
    """Pick a row-tile size TN for the (TN, p) X block.

    - Accounts for lane padding: a (TN, p) block occupies
      TN * itemsize * 128*ceil(p/128) bytes of VMEM.
    - Targets `budget_bytes` for the double-buffered X stream (2 buffers),
      which stays well inside v7x's 32 MiB scoped VMEM.
    - Rounds TN to a multiple of 128 (unmasked (1, TN) stores, legal
      (TN, p) block under the (8,128)/(16,128) tiling rules).
    - Keeps at least 2 grid steps for mid-size N so v7x's dual TensorCores
      can split the "parallel" grid axis.
    """
    if N < 256:
        return N  # single full-extent block: always a legal block shape

    lane_width = 128 * pl.cdiv(p, 128)            # lane-padded feature width
    row_bytes = lane_width * itemsize
    tn_budget = max(128, (budget_bytes // (2 * row_bytes)) // 128 * 128)

    # Ensure >= 2 grid steps (ideally exactly 2 for mid-size N).
    tn_half = _round_up(pl.cdiv(N, 2), 128)
    return min(tn_budget, tn_half)


# ------------------------------- wrapper ----------------------------------- #

def watson_logpdf(X, mu, kappa, p):
    """Pallas-backed equivalent of Watson.forward(X) -> (N,) float32."""
    N = X.shape[0]

    # ---- scalar parameter setup (glue, not the hot path) ----
    # Softplus(beta=20, threshold=1): linear when x*beta > threshold.
    beta = 20.0
    k = kappa.astype(jnp.float32)
    sp = jnp.where(k * beta > 1.0, k, jnp.log1p(jnp.exp(beta * k)) / beta)
    kappa_pos = jnp.maximum(sp, 1e-25).reshape(())

    # log_kummer(a=0.5, b=p/2, kappa_pos) with 1000 series terms.
    a = jnp.float32(0.5)
    b = jnp.float32(p / 2.0)
    n = jnp.arange(1000, dtype=jnp.float32)
    inner = (gammaln(a + n) + gammaln(b) - gammaln(a) - gammaln(b + n)
             + n * jnp.log(kappa_pos) - gammaln(n + 1.0))
    logkum = logsumexp(inner, axis=0)

    # log sphere surface: lgamma(p/2) - log(2 * pi**(p/2))
    log_sa = gammaln(jnp.float32(p / 2.0)) - jnp.log(
        jnp.float32(2.0 * np.pi ** (p / 2.0)))
    log_c = log_sa - logkum

    params = jnp.stack([kappa_pos, log_c]).astype(jnp.float32)

    # nn.functional.normalize(mu, dim=0): mu / max(||mu||, 1e-12), hoisted out
    # of the kernel (constant across all grid steps), then cast to X.dtype so
    # the MXU consumes low-precision inputs natively (no per-tile upcast).
    mu32 = mu.astype(jnp.float32)
    mu_unit = (mu32 / jnp.maximum(jnp.sqrt(jnp.sum(mu32 * mu32)),
                                  1e-12)).reshape(1, p).astype(X.dtype)

    TN = _choose_tile_rows(N, p, jnp.dtype(X.dtype).itemsize)
    grid = (pl.cdiv(N, TN),)

    out = pl.pallas_call(
        watson_logpdf_kernel,
        out_shape=jax.ShapeDtypeStruct((1, N), jnp.float32),
        grid_spec=pltpu.PrefetchScalarGridSpec(
            num_scalar_prefetch=0,
            grid=grid,
            in_specs=[
                pl.BlockSpec(memory_space=pltpu.MemorySpace.SMEM),  # params (2,)
                pl.BlockSpec((1, p), lambda i: (0, 0)),             # mu_unit
                pl.BlockSpec((TN, p), lambda i: (i, 0)),            # X row tile
            ],
            out_specs=pl.BlockSpec((1, TN), lambda i: (0, i)),      # lane-dense
        ),
        compiler_params=pltpu.CompilerParams(
            dimension_semantics=("parallel",),
            vmem_limit_bytes=32 * 1024 * 1024,
        ),
    )(params, mu_unit, X)

    return out[0]


# ------------------------- pure-JAX reference ------------------------------ #

def watson_logpdf_ref(X, mu, kappa, p):
    beta = 20.0
    k = kappa.astype(jnp.float32)
    sp = jnp.where(k * beta > 1.0, k, jnp.log1p(jnp.exp(beta * k)) / beta)
    kappa_pos = jnp.maximum(sp, 1e-25).reshape(())
    a, b = jnp.float32(0.5), jnp.float32(p / 2.0)
    n = jnp.arange(1000, dtype=jnp.float32)
    inner = (gammaln(a + n) + gammaln(b) - gammaln(a) - gammaln(b + n)
             + n * jnp.log(kappa_pos) - gammaln(n + 1.0))
    log_c = (gammaln(jnp.float32(p / 2.0))
             - jnp.log(jnp.float32(2.0 * np.pi ** (p / 2.0)))
             - logsumexp(inner, axis=0))
    mu_unit = mu.astype(jnp.float32)
    mu_unit = mu_unit / jnp.maximum(jnp.linalg.norm(mu_unit), 1e-12)
    return log_c + kappa_pos * (X.astype(jnp.float32) @ mu_unit) ** 2


# --------------------------------- demo ----------------------------------- #

if __name__ == "__main__":
    p = 32   # feature dimension (must be != 1, as in the torch module)
    N = 8    # small batch of samples

    key = jax.random.PRNGKey(0)
    k_mu, k_kappa, k_x, k_x2 = jax.random.split(key, 4)

    # Deterministic parameter init mirroring the torch module's __init__:
    #   mu    = normalize(rand(p)),  kappa = randint(1, 10) as float32
    mu_raw = jax.random.uniform(k_mu, (p,), dtype=jnp.float32)
    mu = mu_raw / jnp.linalg.norm(mu_raw)
    kappa = jax.random.randint(k_kappa, (1,), 1, 10).astype(jnp.float32)

    # Example input X: (N, p) rows normalized to the sphere, as Watson expects
    X = jax.random.normal(k_x, (N, p), dtype=jnp.float32)
    X = X / jnp.linalg.norm(X, axis=1, keepdims=True)

    logpdf = watson_logpdf(X, mu, kappa, p)
    jax.block_until_ready(logpdf)
    ref = watson_logpdf_ref(X, mu, kappa, p)
    np.testing.assert_allclose(np.asarray(logpdf), np.asarray(ref),
                               rtol=1e-5, atol=1e-5)

    # Also exercise the tiled path (grid = 2 with a masked partial tail tile).
    N2 = 2050
    X2 = jax.random.normal(k_x2, (N2, p), dtype=jnp.float32)
    X2 = X2 / jnp.linalg.norm(X2, axis=1, keepdims=True)
    logpdf2 = watson_logpdf(X2, mu, kappa, p)
    jax.block_until_ready(logpdf2)
    ref2 = watson_logpdf_ref(X2, mu, kappa, p)
    np.testing.assert_allclose(np.asarray(logpdf2), np.asarray(ref2),
                               rtol=1e-5, atol=1e-5)

    print("KERNEL_OK")
</pallas_src>

<mosaic_0001>
module attributes {stable_mosaic.version = 11 : i64} {
  func.func @watson_logpdf_kernel(%arg0: i32, %arg1: memref<2xf32, #tpu.memory_space<smem>>, %arg2: memref<1x32xf32, #tpu.memory_space<vmem>>, %arg3: memref<8x32xf32, #tpu.memory_space<vmem>>, %arg4: memref<1x8xf32, #tpu.memory_space<vmem>>) attributes {dimension_semantics = [#tpu.dimension_semantics<parallel>], iteration_bounds = array<i64: 1>, scalar_prefetch = 0 : i64, scratch_operands = 0 : i64, tpu.core_type = #tpu.core_type<tc>, window_params = [{transform_indices = @transform_0, window_bounds = array<i64: 2>}, {pipeline_mode = #tpu.pipeline_mode<synchronous>, transform_indices = @transform_1, window_bounds = array<i64: 1, 32>}, {transform_indices = @transform_2, window_bounds = array<i64: 8, 32>}, {transform_indices = @transform_3, window_bounds = array<i64: 1, 8>}]} {
    %c0 = arith.constant 0 : index
    %0 = memref.load %arg1[%c0] : memref<2xf32, #tpu.memory_space<smem>>
    %c1 = arith.constant 1 : index
    %1 = memref.load %arg1[%c1] : memref<2xf32, #tpu.memory_space<smem>>
    %c0_0 = arith.constant 0 : index
    %c0_1 = arith.constant 0 : index
    %2 = vector.load %arg2[%c0_0, %c0_1] : memref<1x32xf32, #tpu.memory_space<vmem>>, vector<1x32xf32>
    %c0_2 = arith.constant 0 : index
    %c0_3 = arith.constant 0 : index
    %3 = vector.load %arg3[%c0_2, %c0_3] : memref<8x32xf32, #tpu.memory_space<vmem>>, vector<8x32xf32>
    %cst = arith.constant dense<0.000000e+00> : vector<1x8xf32>
    %4 = tpu.matmul %2, %3, %cst {dimension_numbers = #tpu.dot_dimension_numbers<[1], [1], [0], [0], [0, 0, 1, 0], [], []>} : vector<1x32xf32>, vector<8x32xf32>, vector<1x8xf32> -> vector<1x8xf32>
    %5 = vector.broadcast %0 : f32 to vector<1x8xf32>
    %6 = arith.mulf %5, %4 : vector<1x8xf32>
    %7 = arith.mulf %6, %4 : vector<1x8xf32>
    %8 = vector.broadcast %1 : f32 to vector<1x8xf32>
    %9 = arith.addf %8, %7 : vector<1x8xf32>
    %c0_4 = arith.constant 0 : index
    %c0_5 = arith.constant 0 : index
    %10 = vector.load %arg4[%c0_4, %c0_5] : memref<1x8xf32, #tpu.memory_space<vmem>>, vector<1x8xf32>
    tpu.vector_store %arg4[%c0_4, %c0_5], %9 {strides = array<i32>} : memref<1x8xf32, #tpu.memory_space<vmem>>, vector<1x8xf32>,
    return
  }
  func.func @transform_0(%arg0: i32) -> i32 {
    %c0_i32 = arith.constant 0 : i32
    %c0_i32_0 = arith.constant 0 : i32
    return %c0_i32 : i32
  }
  func.func @transform_1(%arg0: i32) -> (i32, i32) {
    %c0_i32 = arith.constant 0 : i32
    %c0_i32_0 = arith.constant 0 : i32
    %c0_i32_1 = arith.constant 0 : i32
    return %c0_i32, %c0_i32_0 : i32, i32
  }
  func.func @transform_2(%arg0: i32) -> (i32, i32) {
    %c0_i32 = arith.constant 0 : i32
    %c0_i32_0 = arith.constant 0 : i32
    return %arg0, %c0_i32 : i32, i32
  }
  func.func @transform_3(%arg0: i32) -> (i32, i32) {
    %c0_i32 = arith.constant 0 : i32
    %c0_i32_0 = arith.constant 0 : i32
    return %c0_i32, %arg0 : i32, i32
  }
}

</mosaic_0001>

<bundles_post_ra>
// kernel: tpu_custom_call.1
= control target key start
LH: loop header
LB: loop body
LE: loop exit
PB: predicated region body
PF: predicated region fallthrough
CT: control target
= control target key end

     0   :  { %8 = vsyncpa [#allocation5], 0  ;;  %s248_s0 = inlined_call_operand.hbm [shape: f32[2], index: 0, kind: input, shape index: {}]   ;;  %s249_s1 = inlined_call_operand.vmem [shape: f32[1,32], index: 1, kind: input, shape index: {}]   ;;  %s250_s2 = inlined_call_operand.hbm [shape: f32[8,32], index: 2, kind: input, shape index: {}]   ;;  %s251_s3 = inlined_call_operand.hbm [shape: f32[1,8], index: 3, kind: output, shape index: {}]  }
   0x1   :  { %9 = vsyncpa [#allocation3], 0 }
   0x2   :  { %10 = vsyncpa [#allocation4], 0  ;;  %s211_s12 = smov [#allocation2]   ;;  %s212_s15 = smov [#allocation6]  }
   0x3   :  { %18 = dma.hbm_to_smem %s248_s0, 16, %s211_s12, [#allocation5]  }
   0x4   :  { %s27_s16 = sshll.u32 %s212_s15, 4  ;;  %s28_s16 = int_to_ptr.vmem [resolvable:$true] %s27_s16 }
   0x5   :  { %s173_s17 = scalar_lea.vmem %s28_s16, 128  ;;  %p178_p1 = scmp.lt.s32.totalorder %s28_s16, %s28_s16 }
   0x6   :  { %p174_p0 = scmp.ne.s32.totalorder %s28_s16, %s173_s17  ;;  %p179_p2 = scmp.lt.s32.totalorder %s173_s17, %s173_s17 }
   0x8   :  { %p180_p3 = por %p179_p2, %p178_p1 }
   0xa   :  { %p181_p4 = pnand %p180_p3, %p174_p0 }
   0xc   :  { %184 = shalt.err (!%p181_p4)
}
   0xd   :  { %30 = dma.hbm_to_vmem [thread:$0]  %s250_s2, 128, %s28_s16, [#allocation3]  }
   0xe   :  { %205 = dma.done.wait [#allocation5], 16  }
   0xf   :  { %206 = vsyncadd [#allocation5], 4294967280 }
  0x10   :  { %207 = dma.done.wait [#allocation3], 128  }
  0x11   :  { %208 = vsyncadd [#allocation3], 4294967168 }
  0x12   :  { %37 = sfence }
  0x13   :  { %v41_v0 = vld [vmem:[#allocation6] sm:$0xff]  ;;  %vm42_vm0 = vcmask 261120   ;;  %v213_v1 = vmov 0.0   ;;  %vm214_vm1 = vmmov 0   ;;  %s38_s21 = sld [smem:[#allocation2]]  ;;  %s215_s2 = smov [#allocation7]  }
  0x14   :  { %147 = vmatprep.subr.mxu0 %v213_v1  ;;  %149 = vmatprep.mubr.msk.f32.mxu0 %vm214_vm1, %v213_v1  ;;  %v40_v2 = vld [vmem:[%s249_s1] sm:$0x1]  ;;  %s142_s22 = sld [smem:[#allocation2 + $0x1]]  ;;  %s132_s23 = sshll.u32 %s215_s2, 4  ;;  %vm124_vm2 = vcmask 57344   ;;  %s133_s23 = int_to_ptr.vmem [resolvable:$true] %s132_s23 }
  0x15   :  { %148 = vmatpush3.xpose.msk.msra.mxu0 %vm42_vm0, %v41_v0  ;;  %s185_s24 = scalar_lea.vmem %s133_s23, 16  ;;  %s189_s25 = scalar_lea.vmem %s133_s23, 32 }
  0x16   :  { %p186_p5 = scmp.ne.s32.totalorder %s133_s23, %s185_s24  ;;  %p190_p6 = scmp.lt.s32.totalorder %s133_s23, %s133_s23 }
  0x17   :  { %p191_p7 = scmp.lt.s32.totalorder %s189_s25, %s185_s24 }
  0x18   :  { %150 = vmatmul.mubr.msk.f32.vlgmr.msra.gmra.mxu0 %vm42_vm0, %v40_v2 }
  0x19   :  { %v119_v3 = vstv %s38_s21  ;;  %p192_p8 = por %p191_p7, %p190_p6 }
  0x1a   :  { %v122_v7 = vstv %s142_s22 }
  0x1b   :  { %p193_p9 = pnand %p192_p8, %p186_p5 }
  0xd8   :  { %v115_v4 = vpop.f32.mrf.mxu0 }
  0xd9   :  { %v120_v5 = vmul.f32 %v119_v3, %v115_v4 }
  0xda   :  { %v151_v6 = vpop.f32.mrf.mxu0 }
  0xdb   :  { %v121_v8 = vmul.f32 %v120_v5, %v115_v4 }
  0xdd   :  { %v123_v9 = vadd.f32 %v122_v7, %v121_v8 }
  0xdf   :  { %125 = vst.msk [vmem:[#allocation7] sm:$0x1] %vm124_vm2, %v123_v9 }
  0xe0   :  { %196 = shalt.err (!%p193_p9)
}
  0xe1   :  { %135 = dma.vmem_to_hbm [thread:$0]  %s133_s23, 16, %s251_s3, [#allocation4]  }
  0xe2   :  { %209 = dma.done.wait [#allocation4], 16  }
  0xe3   :  { %210 = vsyncadd [#allocation4], 4294967280 }
  0xe4   :  { %139 = vsyncpa [#allocation3], 1 }
  0xe5   :  { %140 = vsyncpa [#allocation4], 1 }
  0xe6   :  { %141 = vsyncpa [#allocation5], 1 }

</bundles_post_ra>
